<compile_context>
chip_gen: v5e
topology: v5e:2x2
jax: 0.10.0
libtpu: 0.0.40
codegen_flags: <defaults>
</compile_context>

<pallas_src>
import functools
import math

import jax
import jax.numpy as jnp
from jax.experimental import pallas as pl
from jax.experimental.pallas import tpu as pltpu


def _round_up(x, m):
    return (x + m - 1) // m * m


def _noisy_linear_kernel(x_ref, wmu_ref, wsig_ref, ein_ref, eout_ref, bias_ref,
                         o_ref, acc_ref, *, compute_dtype):
    k = pl.program_id(2)

    @pl.when(k == 0)
    def _():
        acc_ref[...] = jnp.zeros_like(acc_ref)

    # Factorized noise: weight_epsilon tile = eps_in (tk,1) * eps_out (1,tn).
    w_eps = ein_ref[...] * eout_ref[...]                       # (tk, tn) broadcast
    # Effective weight tile, already in [K, N] layout -> feeds the MXU directly.
    w_eff = wmu_ref[...] + wsig_ref[...] * w_eps               # f32 on the VPU

    acc_ref[...] += jnp.dot(
        x_ref[...].astype(compute_dtype),
        w_eff.astype(compute_dtype),
        preferred_element_type=jnp.float32,
    )

    @pl.when(k == pl.num_programs(2) - 1)
    def _():
        # bias_ref is (2, tn): row 0 = bias_mu, row 1 = bias_sigma; bias_eps == eps_out.
        b_eff = bias_ref[0:1, :] + bias_ref[1:2, :] * eout_ref[...]   # (1, tn)
        o_ref[...] = (acc_ref[...] + b_eff).astype(o_ref.dtype)


def noisy_linear(x, weight_mu, weight_sigma, eps_in, eps_out, bias_mu, bias_sigma,
                 *, compute_dtype=jnp.float32):
    """NoisyLinear forward. weight_* in PyTorch (out, in) convention.

    weight_epsilon is implicitly outer(eps_out, eps_in), bias_epsilon == eps_out
    (exactly what the module's reset_noise() installs).
    """
    B, in_f = x.shape
    out_f = weight_mu.shape[0]

    # Pre-transpose weights once to [in, out] so the kernel never transposes.
    wmu_t = weight_mu.T.astype(jnp.float32)
    wsig_t = weight_sigma.T.astype(jnp.float32)

    # Tile targets (f32); padded dims are forced to be multiples of the tiles.
    tm_t, tn_t, tk_t = 128, 256, 512
    m_pad = _round_up(B, 8)
    tm = m_pad if m_pad <= tm_t else tm_t
    m_pad = _round_up(m_pad, tm)
    n_pad = _round_up(out_f, 128)
    tn = n_pad if n_pad <= tn_t else tn_t
    n_pad = _round_up(n_pad, tn)
    k_pad = _round_up(in_f, 128)
    tk = k_pad if k_pad <= tk_t else tk_t
    k_pad = _round_up(k_pad, tk)

    xp = jnp.pad(x.astype(jnp.float32), ((0, m_pad - B), (0, k_pad - in_f)))
    wmu_p = jnp.pad(wmu_t, ((0, k_pad - in_f), (0, n_pad - out_f)))
    wsig_p = jnp.pad(wsig_t, ((0, k_pad - in_f), (0, n_pad - out_f)))
    ein_p = jnp.pad(eps_in.astype(jnp.float32).reshape(in_f, 1),
                    ((0, k_pad - in_f), (0, 0)))
    eout_p = jnp.pad(eps_out.astype(jnp.float32).reshape(1, out_f),
                     ((0, 0), (0, n_pad - out_f)))
    bias_p = jnp.pad(jnp.stack([bias_mu, bias_sigma]).astype(jnp.float32),
                     ((0, 0), (0, n_pad - out_f)))

    grid = (m_pad // tm, n_pad // tn, k_pad // tk)
    kernel = functools.partial(_noisy_linear_kernel, compute_dtype=compute_dtype)

    out = pl.pallas_call(
        kernel,
        out_shape=jax.ShapeDtypeStruct((m_pad, n_pad), jnp.float32),
        grid_spec=pltpu.PrefetchScalarGridSpec(
            num_scalar_prefetch=0,
            grid=grid,
            in_specs=[
                pl.BlockSpec((tm, tk), lambda i, j, k: (i, k)),   # x
                pl.BlockSpec((tk, tn), lambda i, j, k: (k, j)),   # weight_mu^T
                pl.BlockSpec((tk, tn), lambda i, j, k: (k, j)),   # weight_sigma^T
                pl.BlockSpec((tk, 1), lambda i, j, k: (k, 0)),    # eps_in (column)
                pl.BlockSpec((1, tn), lambda i, j, k: (0, j)),    # eps_out (row)
                pl.BlockSpec((2, tn), lambda i, j, k: (0, j)),    # [bias_mu; bias_sigma]
            ],
            out_specs=pl.BlockSpec((tm, tn), lambda i, j, k: (i, j)),
            scratch_shapes=[pltpu.VMEM((tm, tn), jnp.float32)],
        ),
        compiler_params=pltpu.CompilerParams(
            dimension_semantics=("parallel", "parallel", "arbitrary")),
    )(xp, wmu_p, wsig_p, ein_p, eout_p, bias_p)

    return out[:B, :out_f]


def scale_noise(key, size):
    """Factorized Gaussian noise: sign(x) * sqrt(|x|)."""
    x = jax.random.normal(key, (size,), dtype=jnp.float32)
    return jnp.sign(x) * jnp.sqrt(jnp.abs(x))


if __name__ == "__main__":
    in_features, out_features, batch, std_init = 32, 64, 8, 0.5

    key = jax.random.PRNGKey(0)
    k_x, k_wmu, k_bmu, k_ein, k_eout = jax.random.split(key, 5)

    # Deterministic parameter init mirroring reset_parameters().
    mu_range = 1.0 / math.sqrt(in_features)
    weight_mu = jax.random.uniform(
        k_wmu, (out_features, in_features), jnp.float32, -mu_range, mu_range)
    weight_sigma = jnp.full((out_features, in_features),
                            std_init / math.sqrt(in_features), jnp.float32)
    bias_mu = jax.random.uniform(
        k_bmu, (out_features,), jnp.float32, -mu_range, mu_range)
    bias_sigma = jnp.full((out_features,),
                          std_init / math.sqrt(out_features), jnp.float32)

    # reset_noise(): factorized Gaussian noise.
    eps_in = scale_noise(k_ein, in_features)
    eps_out = scale_noise(k_eout, out_features)

    x = jax.random.normal(k_x, (batch, in_features), dtype=jnp.float32)

    # Pure-JAX reference (identical to the PyTorch forward).
    weight_epsilon = jnp.outer(eps_out, eps_in)
    w_eff = weight_mu + weight_sigma * weight_epsilon
    b_eff = bias_mu + bias_sigma * eps_out
    y_ref = x @ w_eff.T + b_eff

    # f32 path (exact forward semantics).
    y = noisy_linear(x, weight_mu, weight_sigma, eps_in, eps_out,
                     bias_mu, bias_sigma)
    y = jax.block_until_ready(y)
    assert y.shape == (batch, out_features)
    assert jnp.allclose(y, y_ref, atol=1e-5, rtol=1e-5), \
        float(jnp.max(jnp.abs(y - y_ref)))

    # Optional bf16-operand MXU path (v6e/v7x), f32 accumulation.
    y_bf16 = jax.block_until_ready(
        noisy_linear(x, weight_mu, weight_sigma, eps_in, eps_out,
                     bias_mu, bias_sigma, compute_dtype=jnp.bfloat16))
    assert jnp.allclose(y_bf16, y_ref, atol=1e-1, rtol=1e-1)

    print("KERNEL_OK")
</pallas_src>

<mosaic_0001>
module attributes {stable_mosaic.version = 11 : i64} {
  func.func @_noisy_linear_kernel(%arg0: i32, %arg1: i32, %arg2: i32, %arg3: memref<8x128xf32, #tpu.memory_space<vmem>>, %arg4: memref<128x128xf32, #tpu.memory_space<vmem>>, %arg5: memref<128x128xf32, #tpu.memory_space<vmem>>, %arg6: memref<128x1xf32, #tpu.memory_space<vmem>>, %arg7: memref<1x128xf32, #tpu.memory_space<vmem>>, %arg8: memref<2x128xf32, #tpu.memory_space<vmem>>, %arg9: memref<8x128xf32, #tpu.memory_space<vmem>>, %arg10: memref<8x128xf32, #tpu.memory_space<vmem>>) attributes {dimension_semantics = [#tpu.dimension_semantics<parallel>, #tpu.dimension_semantics<parallel>, #tpu.dimension_semantics<arbitrary>], iteration_bounds = array<i64: 1, 1, 1>, scalar_prefetch = 0 : i64, scratch_operands = 1 : i64, tpu.core_type = #tpu.core_type<tc>, window_params = [{transform_indices = @transform_0, window_bounds = array<i64: 8, 128>}, {transform_indices = @transform_1, window_bounds = array<i64: 128, 128>}, {transform_indices = @transform_2, window_bounds = array<i64: 128, 128>}, {transform_indices = @transform_3, window_bounds = array<i64: 128, 1>}, {transform_indices = @transform_4, window_bounds = array<i64: 1, 128>}, {transform_indices = @transform_5, window_bounds = array<i64: 2, 128>}, {transform_indices = @transform_6, window_bounds = array<i64: 8, 128>}]} {
    %c0_i32 = arith.constant 0 : i32
    %0 = arith.cmpi eq, %arg2, %c0_i32 : i32
    %1 = arith.extui %0 : i1 to i32
    %c0_i32_0 = arith.constant 0 : i32
    %2 = arith.cmpi ne, %1, %c0_i32_0 : i32
    scf.if %2 {
      %cst_16 = arith.constant 0.000000e+00 : f32
      %20 = vector.broadcast %cst_16 : f32 to vector<8x128xf32>
      %c0_17 = arith.constant 0 : index
      %c0_18 = arith.constant 0 : index
      %21 = vector.load %arg10[%c0_17, %c0_18] : memref<8x128xf32, #tpu.memory_space<vmem>>, vector<8x128xf32>
      tpu.vector_store %arg10[%c0_17, %c0_18], %20 {strides = array<i32>} : memref<8x128xf32, #tpu.memory_space<vmem>>, vector<8x128xf32>,
    } else {
    }
    %c0 = arith.constant 0 : index
    %c0_1 = arith.constant 0 : index
    %3 = vector.load %arg6[%c0, %c0_1] : memref<128x1xf32, #tpu.memory_space<vmem>>, vector<128x1xf32>
    %c0_2 = arith.constant 0 : index
    %c0_3 = arith.constant 0 : index
    %4 = vector.load %arg7[%c0_2, %c0_3] : memref<1x128xf32, #tpu.memory_space<vmem>>, vector<1x128xf32>
    %5 = vector.broadcast %3 : vector<128x1xf32> to vector<128x128xf32>
    %6 = vector.broadcast %4 : vector<1x128xf32> to vector<128x128xf32>
    %7 = arith.mulf %5, %6 : vector<128x128xf32>
    %c0_4 = arith.constant 0 : index
    %c0_5 = arith.constant 0 : index
    %8 = vector.load %arg4[%c0_4, %c0_5] : memref<128x128xf32, #tpu.memory_space<vmem>>, vector<128x128xf32>
    %c0_6 = arith.constant 0 : index
    %c0_7 = arith.constant 0 : index
    %9 = vector.load %arg5[%c0_6, %c0_7] : memref<128x128xf32, #tpu.memory_space<vmem>>, vector<128x128xf32>
    %10 = arith.mulf %9, %7 : vector<128x128xf32>
    %11 = arith.addf %8, %10 : vector<128x128xf32>
    %c0_8 = arith.constant 0 : index
    %c0_9 = arith.constant 0 : index
    %12 = vector.load %arg10[%c0_8, %c0_9] : memref<8x128xf32, #tpu.memory_space<vmem>>, vector<8x128xf32>
    %c0_10 = arith.constant 0 : index
    %c0_11 = arith.constant 0 : index
    %13 = vector.load %arg3[%c0_10, %c0_11] : memref<8x128xf32, #tpu.memory_space<vmem>>, vector<8x128xf32>
    %cst = arith.constant dense<0.000000e+00> : vector<8x128xf32>
    %14 = tpu.matmul %13, %11, %cst {dimension_numbers = #tpu.dot_dimension_numbers<[1], [0], [0], [1], [0, 0, 1, 1], [], []>} : vector<8x128xf32>, vector<128x128xf32>, vector<8x128xf32> -> vector<8x128xf32>
    %15 = arith.addf %12, %14 : vector<8x128xf32>
    %c0_12 = arith.constant 0 : index
    %c0_13 = arith.constant 0 : index
    %16 = vector.load %arg10[%c0_12, %c0_13] : memref<8x128xf32, #tpu.memory_space<vmem>>, vector<8x128xf32>
    tpu.vector_store %arg10[%c0_12, %c0_13], %15 {strides = array<i32>} : memref<8x128xf32, #tpu.memory_space<vmem>>, vector<8x128xf32>,
    %c0_i32_14 = arith.constant 0 : i32
    %17 = arith.cmpi eq, %arg2, %c0_i32_14 : i32
    %18 = arith.extui %17 : i1 to i32
    %c0_i32_15 = arith.constant 0 : i32
    %19 = arith.cmpi ne, %18, %c0_i32_15 : i32
    scf.if %19 {
      %c0_16 = arith.constant 0 : index
      %c0_17 = arith.constant 0 : index
      %20 = vector.load %arg8[%c0_16, %c0_17] : memref<2x128xf32, #tpu.memory_space<vmem>>, vector<1x128xf32>
      %c1 = arith.constant 1 : index
      %c0_18 = arith.constant 0 : index
      %21 = vector.load %arg8[%c1, %c0_18] : memref<2x128xf32, #tpu.memory_space<vmem>>, vector<1x128xf32>
      %c0_19 = arith.constant 0 : index
      %c0_20 = arith.constant 0 : index
      %22 = vector.load %arg7[%c0_19, %c0_20] : memref<1x128xf32, #tpu.memory_space<vmem>>, vector<1x128xf32>
      %23 = arith.mulf %21, %22 : vector<1x128xf32>
      %24 = arith.addf %20, %23 : vector<1x128xf32>
      %c0_21 = arith.constant 0 : index
      %c0_22 = arith.constant 0 : index
      %25 = vector.load %arg10[%c0_21, %c0_22] : memref<8x128xf32, #tpu.memory_space<vmem>>, vector<8x128xf32>
      %26 = vector.broadcast %24 : vector<1x128xf32> to vector<8x128xf32>
      %27 = arith.addf %25, %26 : vector<8x128xf32>
      %c0_23 = arith.constant 0 : index
      %c0_24 = arith.constant 0 : index
      %28 = vector.load %arg9[%c0_23, %c0_24] : memref<8x128xf32, #tpu.memory_space<vmem>>, vector<8x128xf32>
      tpu.vector_store %arg9[%c0_23, %c0_24], %27 {strides = array<i32>} : memref<8x128xf32, #tpu.memory_space<vmem>>, vector<8x128xf32>,
    } else {
    }
    return
  }
  func.func @transform_0(%arg0: i32, %arg1: i32, %arg2: i32) -> (i32, i32) {
    %c0_i32 = arith.constant 0 : i32
    return %arg0, %arg2 : i32, i32
  }
  func.func @transform_1(%arg0: i32, %arg1: i32, %arg2: i32) -> (i32, i32) {
    %c0_i32 = arith.constant 0 : i32
    return %arg2, %arg1 : i32, i32
  }
  func.func @transform_2(%arg0: i32, %arg1: i32, %arg2: i32) -> (i32, i32) {
    %c0_i32 = arith.constant 0 : i32
    return %arg2, %arg1 : i32, i32
  }
  func.func @transform_3(%arg0: i32, %arg1: i32, %arg2: i32) -> (i32, i32) {
    %c0_i32 = arith.constant 0 : i32
    %c0_i32_0 = arith.constant 0 : i32
    return %arg2, %c0_i32 : i32, i32
  }
  func.func @transform_4(%arg0: i32, %arg1: i32, %arg2: i32) -> (i32, i32) {
    %c0_i32 = arith.constant 0 : i32
    %c0_i32_0 = arith.constant 0 : i32
    return %c0_i32, %arg1 : i32, i32
  }
  func.func @transform_5(%arg0: i32, %arg1: i32, %arg2: i32) -> (i32, i32) {
    %c0_i32 = arith.constant 0 : i32
    %c0_i32_0 = arith.constant 0 : i32
    return %c0_i32, %arg1 : i32, i32
  }
  func.func @transform_6(%arg0: i32, %arg1: i32, %arg2: i32) -> (i32, i32) {
    %c0_i32 = arith.constant 0 : i32
    return %arg0, %arg1 : i32, i32
  }
}

</mosaic_0001>

<bundles_post_ra>
// kernel: tpu_custom_call.1
= control target key start
LH: loop header
LB: loop body
LE: loop exit
PB: predicated region body
PF: predicated region fallthrough
CT: control target
= control target key end

     0   :  { %11 = vsyncpa [#allocation4], 0  ;;  %s557_s0 = inlined_call_operand.hbm [shape: f32[8,128], index: 0, kind: input, shape index: {}]   ;;  %s558_s1 = inlined_call_operand.vmem [shape: f32[128,128], index: 1, kind: input, shape index: {}]   ;;  %s559_s2 = inlined_call_operand.hbm [shape: f32[128,128], index: 2, kind: input, shape index: {}]   ;;  %s560_s3 = inlined_call_operand.vmem [shape: f32[128,1], index: 3, kind: input, shape index: {}]   ;;  %s561_s4 = inlined_call_operand.vmem [shape: f32[1,128], index: 4, kind: input, shape index: {}]   ;;  %s562_s5 = inlined_call_operand.vmem [shape: f32[2,128], index: 5, kind: input, shape index: {}]   ;;  %s563_s6 = inlined_call_operand.hbm [shape: f32[8,128], index: 6, kind: output, shape index: {}]  }
   0x1   :  { %12 = vsyncpa [#allocation7], 0 }
   0x2   :  { %13 = vsyncpa [#allocation5], 0  ;;  %s19_s23 = sshll.u32 %s557_s0, 4  ;;  %s381_s24 = smov [#allocation3]   ;;  %s20_s23 = int_to_ptr.hbm [resolvable:$true] %s19_s23 }
   0x3   :  { %s21_s25 = sshll.u32 %s381_s24, 4  ;;  %s31_s28 = sshll.u32 %s559_s2, 4  ;;  %s22_s25 = int_to_ptr.vmem [resolvable:$true] %s21_s25  ;;  %s32_s28 = int_to_ptr.hbm [resolvable:$true] %s31_s28 }
   0x4   :  { %24 = dma.hbm_to_vmem [thread:$0]  %s20_s23, 128, %s22_s25, [#allocation4]  }
   0x5   :  { %s382_s29 = smov [#allocation6]   ;;  %s383_s7 = smov 128  }
   0x6   :  { %s33_s30 = sshll.u32 %s382_s29, 4  ;;  %s384_s8 = smov 8   ;;  %s34_s30 = int_to_ptr.vmem [resolvable:$true] %s33_s30 }
   0x7   :  { %39 = dma.hbm_to_vmem [thread:$0]  %s32_s28, 2048, %s34_s30, [#allocation7], %s383_s7, %s383_s7, %s384_s8  }
   0x8   :  { %375 = dma.done.wait [#allocation4], 128  }
   0x9   :  { %376 = vsyncadd [#allocation4], 4294967168 }
   0xa   :  { %377 = dma.done.wait [#allocation7], 2048  }
   0xb   :  { %378 = vsyncadd [#allocation7], 4294965248  ;;  %v385_v0 = vmov 0   ;;  %v74_v1 = vld [vmem:[%s560_s3 + $0x78] sm:$0xff]  ;;  %v72_v2 = vld [vmem:[%s560_s3 + $0x68] sm:$0xff]  ;;  %s282_s28 = sshll.u32 %s563_s6, 4  ;;  %s283_s28 = int_to_ptr.hbm [resolvable:$true] %s282_s28 }
   0xc   :  { %301 = vset.pattern.permute.xlu2 %v385_v0  ;;  %300 = vset.pattern.permute.xlu1 %v385_v0  ;;  %v70_v3 = vld [vmem:[%s560_s3 + $0x58] sm:$0xff]  ;;  %v73_v4 = vld [vmem:[%s560_s3 + $0x70] sm:$0xff]  ;;  %v71_v5 = vld [vmem:[%s560_s3 + $0x60] sm:$0xff] }
   0xd   :  { %299 = vset.pattern.permute.xlu0 %v385_v0  ;;  %143 = vperm.xlu1 %300, %v72_v2   ;;  %v69_v6 = vld [vmem:[%s560_s3 + $0x50] sm:$0xff]  ;;  %v68_v7 = vld [vmem:[%s560_s3 + $0x48] sm:$0xff]  ;;  %v67_v8 = vld [vmem:[%s560_s3 + $0x40] sm:$0xff] }
   0xe   :  { %153 = vperm.xlu0 %299, %v74_v1   ;;  %133 = vperm.xlu2 %301, %v70_v3   ;;  %v66_v9 = vld [vmem:[%s560_s3 + $0x38] sm:$0xff]  ;;  %v65_v10 = vld [vmem:[%s560_s3 + $0x30] sm:$0xff]  ;;  %v64_v11 = vld [vmem:[%s560_s3 + $0x28] sm:$0xff] }
   0xf   :  { %v63_v12 = vld [vmem:[%s560_s3 + $0x20] sm:$0xff]  ;;  %v62_v13 = vld [vmem:[%s560_s3 + $0x18] sm:$0xff]  ;;  %v61_v14 = vld [vmem:[%s560_s3 + $0x10] sm:$0xff] }
  0x10   :  { %v60_v15 = vld [vmem:[%s560_s3 + $0x8] sm:$0xff]  ;;  %v59_v16 = vld [vmem:[%s560_s3] sm:$0xff]  ;;  %v190_v24 = vld [vmem:[%s558_s1 + $0x78] sm:$0xff] }
  0x11   :  { %v479_v18 = vld [vmem:[%s561_s4] ss:$0 sm:$0xff]  ;;  %v204_v28 = vld [vmem:[#allocation6 + $0x68] sm:$0xff]  ;;  %v205_v29 = vld [vmem:[#allocation6 + $0x70] sm:$0xff] }
  0x12   :  { %v206_v22 = vld [vmem:[#allocation6 + $0x78] sm:$0xff]  ;;  %v203_v35 = vld [vmem:[#allocation6 + $0x60] sm:$0xff]  ;;  %v189_v36 = vld [vmem:[%s558_s1 + $0x70] sm:$0xff] }
  0x13   :  { %v202_v40 = vld [vmem:[#allocation6 + $0x58] sm:$0xff]  ;;  %v188_v41 = vld [vmem:[%s558_s1 + $0x68] sm:$0xff]  ;;  %v201_v45 = vld [vmem:[#allocation6 + $0x50] sm:$0xff] }
  0x14   :  { %v187_v46 = vld [vmem:[%s558_s1 + $0x60] sm:$0xff]  ;;  %v200_v49 = vld [vmem:[#allocation6 + $0x48] sm:$0xff]  ;;  %v186_v52 = vld [vmem:[%s558_s1 + $0x58] sm:$0xff] }
  0x15   :  { %138 = vperm.xlu1 %300, %v71_v5   ;;  %v199_v57 = vld [vmem:[#allocation6 + $0x40] sm:$0xff]  ;;  %v185_v58 = vld [vmem:[%s558_s1 + $0x50] sm:$0xff]  ;;  %v198_v62 = vld [vmem:[#allocation6 + $0x38] sm:$0xff] }
  0x16   :  { %148 = vperm.xlu0 %299, %v73_v4   ;;  %128 = vperm.xlu2 %301, %v69_v6   ;;  %v184_v0 = vld [vmem:[%s558_s1 + $0x48] sm:$0xff]  ;;  %v183_v3 = vld [vmem:[%s558_s1 + $0x40] sm:$0xff]  ;;  %v197_v6 = vld [vmem:[#allocation6 + $0x30] sm:$0xff] }
  0x1d   :  { %118 = vperm.xlu1 %300, %v67_v8   ;;  %v196_v8 = vld [vmem:[#allocation6 + $0x28] sm:$0xff] }
  0x1e   :  { %123 = vperm.xlu0 %299, %v68_v7   ;;  %113 = vperm.xlu2 %301, %v66_v9  }
  0x25   :  { %103 = vperm.xlu1 %300, %v64_v11  }
  0x26   :  { %108 = vperm.xlu0 %299, %v65_v10   ;;  %98 = vperm.xlu2 %301, %v63_v12   ;;  %v182_v10 = vld [vmem:[%s558_s1 + $0x38] sm:$0xff] }
  0x2d   :  { %88 = vperm.xlu1 %300, %v61_v14  }
  0x2e   :  { %93 = vperm.xlu0 %299, %v62_v13   ;;  %83 = vperm.xlu2 %301, %v60_v15   ;;  %v195_v15 = vld [vmem:[#allocation6 + $0x20] sm:$0xff] }
  0x36   :  { %78 = vperm.xlu0 %299, %v59_v16   ;;  %v181_v16 = vld [vmem:[%s558_s1 + $0x30] sm:$0xff] }
  0x68   :  { %v134_v17 = vpop.permute.xlu2 %133 }
  0x69   :  { %v170_v37 = vmul.f32 %v479_v18, %v134_v17 }
  0x6b   :  { %v218_v47 = vmul.f32 %v202_v40, %v170_v37 }
  0x6d   :  { %v234_v61 = vadd.f32 %v218_v47, %v186_v52  ;;  %v267_v52 = vld [vmem:[%s562_s5 + $0x1] sm:$0x1] }
  0x70   :  { %v129_v19 = vpop.permute.xlu2 %128 }
  0x71   :  { %v169_v42 = vmul.f32 %v479_v18, %v129_v19 }
  0x73   :  { %v217_v53 = vmul.f32 %v201_v45, %v169_v42  ;;  %v176_v42 = vld [vmem:[%s558_s1 + $0x8] sm:$0xff] }
  0x75   :  { %v233_v2 = vadd.f32 %v217_v53, %v185_v58 }
  0x78   :  { %v114_v34 = vpop.permute.xlu2 %113 }
  0x79   :  { %v166_v59 = vmul.f32 %v479_v18, %v114_v34 }
  0x7b   :  { %v214_v4 = vmul.f32 %v198_v62, %v166_v59 }
  0x7f   :  { %v144_v21 = vpop.permute.xlu1 %143 }
  0x80   :  { %v154_v20 = vpop.permute.xlu0 %153  ;;  %v172_v27 = vmul.f32 %v479_v18, %v144_v21  ;;  %v99_v63 = vpop.permute.xlu2 %98  ;;  %v180_v21 = vld [vmem:[%s558_s1 + $0x28] sm:$0xff] }
  0x81   :  { %v174_v23 = vmul.f32 %v479_v18, %v154_v20  ;;  %v163_v11 = vmul.f32 %v479_v18, %v99_v63  ;;  %v230_v20 = vadd.f32 %v214_v4, %v182_v10 }
  0x82   :  { %v220_v38 = vmul.f32 %v204_v28, %v172_v27  ;;  %v194_v27 = vld [vmem:[#allocation6 + $0x18] sm:$0xff] }
  0x83   :  { %v222_v25 = vmul.f32 %v206_v22, %v174_v23  ;;  %v211_v22 = vmul.f32 %v195_v15, %v163_v11 }
  0x84   :  { %v236_v48 = vadd.f32 %v220_v38, %v188_v41 }
  0x85   :  { %v238_v26 = vadd.f32 %v222_v25, %v190_v24  ;;  %v179_v25 = vld [vmem:[%s558_s1 + $0x20] sm:$0xff] }
  0x86   :  { %v227_v34 = vadd.f32 %v211_v22, %v179_v25 }
  0x87   :  { %241 = vmatpush.msra.mxu0 %v238_v26  ;;  %v139_v31 = vpop.permute.xlu1 %138 }
  0x88   :  { %v149_v30 = vpop.permute.xlu0 %148  ;;  %v171_v33 = vmul.f32 %v479_v18, %v139_v31  ;;  %v84_v24 = vpop.permute.xlu2 %83 }
  0x89   :  { %v173_v32 = vmul.f32 %v479_v18, %v149_v30  ;;  %v160_v31 = vmul.f32 %v479_v18, %v84_v24 }
  0x8a   :  { %v219_v43 = vmul.f32 %v203_v35, %v171_v33  ;;  %v192_v35 = vld [vmem:[#allocation6 + $0x8] sm:$0xff] }
  0x8b   :  { %v221_v39 = vmul.f32 %v205_v29, %v173_v32  ;;  %v193_v29 = vld [vmem:[#allocation6 + $0x10] sm:$0xff]  ;;  %v208_v40 = vmul.f32 %v192_v35, %v160_v31 }
  0x8c   :  { %v235_v56 = vadd.f32 %v219_v43, %v187_v46 }
  0x8d   :  { %v237_v44 = vadd.f32 %v221_v39, %v189_v36  ;;  %v178_v36 = vld [vmem:[%s558_s1 + $0x18] sm:$0xff]  ;;  %v177_v39 = vld [vmem:[%s558_s1 + $0x10] sm:$0xff]  ;;  %v224_v47 = vadd.f32 %v208_v40, %v176_v42 }
  0x8f   :  { %242 = vmatpush.msra.mxu0 %v237_v44  ;;  %v119_v51 = vpop.permute.xlu1 %118  ;;  %v191_v44 = vld [vmem:[#allocation6] sm:$0xff] }
  0x90   :  { %v124_v50 = vpop.permute.xlu0 %123  ;;  %v167_v55 = vmul.f32 %v479_v18, %v119_v51  ;;  %v240_v51 = vld [vmem:[#allocation3] sm:$0xff] }
  0x91   :  { %v168_v54 = vmul.f32 %v479_v18, %v124_v50  ;;  %243 = vmatpush.msra.mxu0 %v236_v48  ;;  %v175_v48 = vld [vmem:[%s558_s1] sm:$0xff]  ;;  %s386_s1 = smov [#allocation8]  }
  0x92   :  { %v215_v1 = vmul.f32 %v199_v57, %v167_v55  ;;  %s280_s25 = sshll.u32 %s386_s1, 4  ;;  %s281_s25 = int_to_ptr.vmem [resolvable:$true] %s280_s25 }
  0x93   :  { %v216_v60 = vmul.f32 %v200_v49, %v168_v54  ;;  %244 = vmatpush.msra.mxu0 %v235_v56  ;;  %v266_v54 = vld [vmem:[%s562_s5] sm:$0x1] }
  0x94   :  { %v231_v14 = vadd.f32 %v215_v1, %v183_v3 }
  0x95   :  { %245 = vmatpush.msra.mxu0 %v234_v61  ;;  %v232_v5 = vadd.f32 %v216_v60, %v184_v0 }
  0x97   :  { %246 = vmatpush.msra.mxu0 %v233_v2  ;;  %v104_v9 = vpop.permute.xlu1 %103 }
  0x98   :  { %v109_v7 = vpop.permute.xlu0 %108  ;;  %v164_v13 = vmul.f32 %v479_v18, %v104_v9 }
  0x99   :  { %v165_v12 = vmul.f32 %v479_v18, %v109_v7  ;;  %247 = vmatpush.msra.mxu0 %v232_v5 }
  0x9a   :  { %v212_v19 = vmul.f32 %v196_v8, %v164_v13 }
  0x9b   :  { %v213_v17 = vmul.f32 %v197_v6, %v165_v12  ;;  %248 = vmatpush.msra.mxu0 %v231_v14 }
  0x9c   :  { %v228_v26 = vadd.f32 %v212_v19, %v180_v21 }
  0x9d   :  { %249 = vmatpush.msra.mxu0 %v230_v20  ;;  %v229_v23 = vadd.f32 %v213_v17, %v181_v16 }
  0x9f   :  { %250 = vmatpush.msra.mxu0 %v229_v23  ;;  %v89_v30 = vpop.permute.xlu1 %88 }
  0xa0   :  { %v94_v28 = vpop.permute.xlu0 %93  ;;  %v161_v33 = vmul.f32 %v479_v18, %v89_v30 }
  0xa1   :  { %v162_v32 = vmul.f32 %v479_v18, %v94_v28  ;;  %251 = vmatpush.msra.mxu0 %v228_v26 }
  0xa2   :  { %v209_v38 = vmul.f32 %v193_v29, %v161_v33 }
  0xa3   :  { %v210_v37 = vmul.f32 %v194_v27, %v162_v32  ;;  %252 = vmatpush.msra.mxu0 %v227_v34 }
  0xa4   :  { %v225_v43 = vadd.f32 %v209_v38, %v177_v39 }
  0xa5   :  { %v226_v41 = vadd.f32 %v210_v37, %v178_v36 }
  0xa7   :  { %253 = vmatpush.msra.mxu0 %v226_v41 }
  0xa8   :  { %v79_v45 = vpop.permute.xlu0 %78 }
  0xa9   :  { %v159_v46 = vmul.f32 %v479_v18, %v79_v45  ;;  %254 = vmatpush.msra.mxu0 %v225_v43  ;;  %v268_v18 = vld [vmem:[%s561_s4] sm:$0x1] }
  0xaa   :  { %v269_v53 = vmul.f32 %v268_v18, %v267_v52 }
  0xab   :  { %v207_v49 = vmul.f32 %v191_v44, %v159_v46  ;;  %255 = vmatpush.msra.mxu0 %v224_v47 }
  0xac   :  { %v270_v55 = vadd.f32 %v269_v53, %v266_v54 }
  0xad   :  { %v223_v50 = vadd.f32 %v207_v49, %v175_v48 }
  0xae   :  { %v272_v56 = vperm.slane %v270_v55, 0 }
  0xaf   :  { %256 = vmatpush.msra.mxu0 %v223_v50 }
  0xb0   :  { %257 = vmatmul.f32.vlgmr.msra.gmra.mxu0 %v240_v51 }
 0x12d   :  { %v258_v57 = vpop.f32.mrf.mxu0 }
 0x12e   :  { %v273_v58 = vadd.f32 %v272_v56, %v258_v57 }
 0x130   :  { %274 = vst [vmem:[#allocation8] sm:$0xff] %v273_v58 }
 0x131   :  { %285 = dma.vmem_to_hbm [thread:$0]  %s281_s25, 128, %s283_s28, [#allocation5]  }
 0x132   :  { %379 = dma.done.wait [#allocation5], 128  }
 0x133   :  { %380 = vsyncadd [#allocation5], 4294967168 }
 0x134   :  { %290 = vsyncpa [#allocation4], 1 }
 0x135   :  { %291 = vsyncpa [#allocation7], 1 }
 0x136   :  { %292 = vsyncpa [#allocation5], 1 }

</bundles_post_ra>
